<compile_context>
chip_gen: v7x
topology: tpu7x:2x2x1
jax: 0.10.0
libtpu: 0.0.40
codegen_flags: <defaults>
</compile_context>

<pallas_src>
import functools

import jax
import jax.numpy as jnp
from jax import lax
from jax.experimental import pallas as pl
from jax.experimental.pallas import tpu as pltpu


def _round_up(n, m):
    return ((n + m - 1) // m) * m


def mlp_kernel(x_ref, w1_ref, b1_ref, w2_ref, b2_ref, o_ref):
    # ---- layer 1: x @ W1 + b1, ReLU (MXU, f32 accumulation) ----
    h = jnp.dot(x_ref[...], w1_ref[...], preferred_element_type=jnp.float32)
    h = jnp.maximum(h + b1_ref[...], 0.0)                       # (TB, Hp), f32

    # ---- layer 2: H -> 1 projection, produced lane-dense ----
    # (1, Hp) contracted with h over its last dim -> (1, TB): output occupies a
    # full 128-lane row per vreg instead of a width-1 column (no masked stores,
    # no >99%-idle MXU result lanes).
    z = lax.dot_general(
        w2_ref[...], h.astype(w2_ref.dtype),
        dimension_numbers=(((1,), (1,)), ((), ())),
        preferred_element_type=jnp.float32,
    )                                                           # (1, TB)

    # b2 comes from SMEM as a scalar (free on the scalar path).
    out_row = jax.nn.sigmoid(z + b2_ref[0])                     # (1, TB)
    o_ref[...] = out_row[None].astype(o_ref.dtype)              # (1, 1, TB)


def neural_net2_forward(x, w1, b1, w2, b2, *, block_b=None, compute_dtype=None):
    """x: (B, D_in); w1: (D_in, H); b1: (1, H) or (H,); w2: (H, 1) or (H,);
    b2: (1, 1) or scalar  ->  (B, 1)."""
    B, d_in = x.shape
    H = w1.shape[1]
    LANE = 128

    # Zero-pad feature dims to full 128-lane tiles (tiny D_in/H would otherwise
    # leave every vreg / MXU pass mostly empty and trip the (8,128) rule).
    d_p = _round_up(max(d_in, 1), LANE)
    h_p = _round_up(max(H, 1), LANE)

    # Batch tile: lane-aligned (=> unmasked lane-dense output stores),
    # 512 is ~85% of HBM roofline in the measured tile sweep; clamp for tiny B.
    if block_b is None:
        block_b = min(512, _round_up(B, LANE))
    block_b = _round_up(block_b, LANE)
    b_p = _round_up(B, block_b)
    g = b_p // block_b

    f32 = jnp.float32
    cdt = compute_dtype if compute_dtype is not None else x.dtype

    # Padded operands (zeros in the padding keep the math exact: padded K
    # contributes 0, padded H has w1=b1=w2=0 so relu(0)=0 contributes 0).
    x_p = jnp.zeros((b_p, d_p), cdt).at[:B, :d_in].set(x.astype(cdt))
    w1_p = jnp.zeros((d_p, h_p), cdt).at[:d_in, :H].set(w1.astype(cdt))
    b1_p = jnp.zeros((1, h_p), f32).at[0, :H].set(jnp.reshape(b1, (-1,)).astype(f32))
    w2_p = jnp.zeros((1, h_p), cdt).at[0, :H].set(jnp.reshape(w2, (-1,)).astype(cdt))
    b2_s = jnp.reshape(jnp.asarray(b2, f32), (1,))

    out = pl.pallas_call(
        mlp_kernel,
        out_shape=jax.ShapeDtypeStruct((g, 1, block_b), x.dtype),
        grid=(g,),
        in_specs=[
            pl.BlockSpec((block_b, d_p), lambda i: (i, 0)),        # x tile (pipelined)
            pl.BlockSpec((d_p, h_p), lambda i: (0, 0)),            # W1 (resident)
            pl.BlockSpec((1, h_p), lambda i: (0, 0)),              # b1 row
            pl.BlockSpec((1, h_p), lambda i: (0, 0)),              # W2 row
            pl.BlockSpec(memory_space=pltpu.MemorySpace.SMEM),     # b2 scalar
        ],
        out_specs=pl.BlockSpec((1, 1, block_b), lambda i: (i, 0, 0)),
        compiler_params=pltpu.CompilerParams(
            dimension_semantics=("parallel",),                     # megacore on v7x
        ),
    )(x_p, w1_p, b1_p, w2_p, b2_s)

    # (g, 1, block_b) lane-dense slab -> (B, 1)
    return out.reshape(b_p)[:B].reshape(B, 1)


def init_params(key, input_size, hidden_size, dtype=jnp.float32):
    """Deterministic init mimicking nn.Linear's U(-1/sqrt(fan_in), 1/sqrt(fan_in))."""
    k1, k2, k3, k4 = jax.random.split(key, 4)
    bound1 = 1.0 / (input_size ** 0.5)
    bound2 = 1.0 / (hidden_size ** 0.5)
    # stored pre-transposed: (in_features, out_features)
    w1 = jax.random.uniform(k1, (input_size, hidden_size), dtype, -bound1, bound1)
    b1 = jax.random.uniform(k2, (1, hidden_size), dtype, -bound1, bound1)
    w2 = jax.random.uniform(k3, (hidden_size, 1), dtype, -bound2, bound2)
    b2 = jax.random.uniform(k4, (1, 1), dtype, -bound2, bound2)
    return w1, b1, w2, b2


if __name__ == "__main__":
    batch, input_size, hidden_size = 8, 16, 32
    key = jax.random.PRNGKey(0)
    kx, kp = jax.random.split(key)
    x = jax.random.normal(kx, (batch, input_size), jnp.float32)
    w1, b1, w2, b2 = init_params(kp, input_size, hidden_size)

    out = neural_net2_forward(x, w1, b1, w2, b2)
    out = jax.block_until_ready(out)

    # reference check in plain JAX
    ref = jax.nn.sigmoid(jnp.maximum(x @ w1 + b1, 0.0) @ w2 + b2)
    assert out.shape == (batch, 1)
    assert jnp.allclose(out, ref, atol=1e-5, rtol=1e-5)

    # bf16 feed path (v6e/v7x MXU): f32 accumulation, loose tolerance
    out_bf16 = jax.block_until_ready(
        neural_net2_forward(x, w1, b1, w2, b2, compute_dtype=jnp.bfloat16))
    assert jnp.allclose(out_bf16, ref, atol=2e-2, rtol=2e-2)

    print("KERNEL_OK")
</pallas_src>

<mosaic_0001>
module attributes {stable_mosaic.version = 11 : i64} {
  func.func @mlp_kernel(%arg0: i32, %arg1: memref<128x128xf32, #tpu.memory_space<vmem>>, %arg2: memref<128x128xf32, #tpu.memory_space<vmem>>, %arg3: memref<1x128xf32, #tpu.memory_space<vmem>>, %arg4: memref<1x128xf32, #tpu.memory_space<vmem>>, %arg5: memref<1xf32, #tpu.memory_space<smem>>, %arg6: memref<1x1x128xf32, #tpu.memory_space<vmem>>) attributes {dimension_semantics = [#tpu.dimension_semantics<parallel>], iteration_bounds = array<i64: 1>, scalar_prefetch = 0 : i64, scratch_operands = 0 : i64, tpu.core_type = #tpu.core_type<tc>, window_params = [{transform_indices = @transform_0, window_bounds = array<i64: 128, 128>}, {pipeline_mode = #tpu.pipeline_mode<synchronous>, transform_indices = @transform_1, window_bounds = array<i64: 128, 128>}, {pipeline_mode = #tpu.pipeline_mode<synchronous>, transform_indices = @transform_2, window_bounds = array<i64: 1, 128>}, {pipeline_mode = #tpu.pipeline_mode<synchronous>, transform_indices = @transform_3, window_bounds = array<i64: 1, 128>}, {transform_indices = @transform_4, window_bounds = array<i64: 1>}, {transform_indices = @transform_5, window_bounds = array<i64: 1, 1, 128>}]} {
    %c0 = arith.constant 0 : index
    %c0_0 = arith.constant 0 : index
    %0 = vector.load %arg1[%c0, %c0_0] : memref<128x128xf32, #tpu.memory_space<vmem>>, vector<128x128xf32>
    %c0_1 = arith.constant 0 : index
    %c0_2 = arith.constant 0 : index
    %1 = vector.load %arg2[%c0_1, %c0_2] : memref<128x128xf32, #tpu.memory_space<vmem>>, vector<128x128xf32>
    %cst = arith.constant dense<0.000000e+00> : vector<128x128xf32>
    %2 = tpu.matmul %0, %1, %cst {dimension_numbers = #tpu.dot_dimension_numbers<[1], [0], [0], [1], [0, 0, 1, 1], [], []>} : vector<128x128xf32>, vector<128x128xf32>, vector<128x128xf32> -> vector<128x128xf32>
    %c0_3 = arith.constant 0 : index
    %c0_4 = arith.constant 0 : index
    %3 = vector.load %arg3[%c0_3, %c0_4] : memref<1x128xf32, #tpu.memory_space<vmem>>, vector<1x128xf32>
    %4 = vector.broadcast %3 : vector<1x128xf32> to vector<128x128xf32>
    %5 = arith.addf %2, %4 : vector<128x128xf32>
    %cst_5 = arith.constant 0.000000e+00 : f32
    %6 = vector.broadcast %cst_5 : f32 to vector<128x128xf32>
    %7 = arith.maximumf %5, %6 : vector<128x128xf32>
    %c0_6 = arith.constant 0 : index
    %c0_7 = arith.constant 0 : index
    %8 = vector.load %arg4[%c0_6, %c0_7] : memref<1x128xf32, #tpu.memory_space<vmem>>, vector<1x128xf32>
    %cst_8 = arith.constant dense<0.000000e+00> : vector<1x128xf32>
    %9 = tpu.matmul %8, %7, %cst_8 {dimension_numbers = #tpu.dot_dimension_numbers<[1], [1], [0], [0], [0, 0, 1, 0], [], []>} : vector<1x128xf32>, vector<128x128xf32>, vector<1x128xf32> -> vector<1x128xf32>
    %c0_9 = arith.constant 0 : index
    %10 = memref.load %arg5[%c0_9] : memref<1xf32, #tpu.memory_space<smem>>
    %11 = vector.broadcast %10 : f32 to vector<1x128xf32>
    %12 = arith.addf %9, %11 : vector<1x128xf32>
    %13 = arith.negf %12 : vector<1x128xf32>
    %14 = math.exp %13 : vector<1x128xf32>
    %cst_10 = arith.constant 1.000000e+00 : f32
    %15 = vector.broadcast %cst_10 : f32 to vector<1x128xf32>
    %16 = arith.addf %15, %14 : vector<1x128xf32>
    %17 = arith.divf %15, %16 : vector<1x128xf32>
    %18 = vector.shape_cast %17 : vector<1x128xf32> to vector<1x1x128xf32>
    %c0_11 = arith.constant 0 : index
    %c0_12 = arith.constant 0 : index
    %c0_13 = arith.constant 0 : index
    %19 = vector.load %arg6[%c0_11, %c0_12, %c0_13] : memref<1x1x128xf32, #tpu.memory_space<vmem>>, vector<1x1x128xf32>
    tpu.vector_store %arg6[%c0_11, %c0_12, %c0_13], %18 {strides = array<i32>} : memref<1x1x128xf32, #tpu.memory_space<vmem>>, vector<1x1x128xf32>,
    return
  }
  func.func @transform_0(%arg0: i32) -> (i32, i32) {
    %c0_i32 = arith.constant 0 : i32
    %c0_i32_0 = arith.constant 0 : i32
    return %arg0, %c0_i32 : i32, i32
  }
  func.func @transform_1(%arg0: i32) -> (i32, i32) {
    %c0_i32 = arith.constant 0 : i32
    %c0_i32_0 = arith.constant 0 : i32
    %c0_i32_1 = arith.constant 0 : i32
    return %c0_i32, %c0_i32_0 : i32, i32
  }
  func.func @transform_2(%arg0: i32) -> (i32, i32) {
    %c0_i32 = arith.constant 0 : i32
    %c0_i32_0 = arith.constant 0 : i32
    %c0_i32_1 = arith.constant 0 : i32
    return %c0_i32, %c0_i32_0 : i32, i32
  }
  func.func @transform_3(%arg0: i32) -> (i32, i32) {
    %c0_i32 = arith.constant 0 : i32
    %c0_i32_0 = arith.constant 0 : i32
    %c0_i32_1 = arith.constant 0 : i32
    return %c0_i32, %c0_i32_0 : i32, i32
  }
  func.func @transform_4(%arg0: i32) -> i32 {
    %c0_i32 = arith.constant 0 : i32
    %c0_i32_0 = arith.constant 0 : i32
    return %c0_i32 : i32
  }
  func.func @transform_5(%arg0: i32) -> (i32, i32, i32) {
    %c0_i32 = arith.constant 0 : i32
    %c0_i32_0 = arith.constant 0 : i32
    %c0_i32_1 = arith.constant 0 : i32
    return %arg0, %c0_i32, %c0_i32_0 : i32, i32, i32
  }
}

</mosaic_0001>

<bundles_post_ra>
// kernel: tpu_custom_call.1
= control target key start
LH: loop header
LB: loop body
LE: loop exit
PB: predicated region body
PF: predicated region fallthrough
CT: control target
= control target key end

     0   :  { %11 = vsyncpa [#allocation4], 0  ;;  %s719_s0 = inlined_call_operand.hbm [shape: f32[128,128], index: 0, kind: input, shape index: {}]   ;;  %s720_s1 = inlined_call_operand.hbm [shape: f32[128,128], index: 1, kind: input, shape index: {}]   ;;  %s721_s2 = inlined_call_operand.vmem [shape: f32[1,128], index: 2, kind: input, shape index: {}]   ;;  %s722_s3 = inlined_call_operand.vmem [shape: f32[1,128], index: 3, kind: input, shape index: {}]   ;;  %s723_s4 = inlined_call_operand.<no memory space> [shape: f32[1], index: 4, kind: input, shape index: {}]   ;;  %s724_s5 = inlined_call_operand.hbm [shape: f32[1,1,128], index: 5, kind: output, shape index: {}]  }
   0x1   :  { %12 = vsyncpa [#allocation7], 0 }
   0x2   :  { %13 = vsyncpa [#allocation5], 0  ;;  %s628_s18 = smov [#allocation3]   ;;  %s556_s22 = scalar_lea.hbm %s719_s0, 2048 }
   0x3   :  { %s19_s19 = sshll.u32 %s628_s18, 4  ;;  %p557_p0 = scmp.ne.s32.totalorder %s719_s0, %s556_s22  ;;  %s20_s19 = int_to_ptr.vmem [resolvable:$true] %s19_s19 }
   0x4   :  { %p560_p1 = scmp.lt.u32.totalorder %s556_s22, %s719_s0 }
   0x6   :  { %p562_p2 = pnand %p560_p1, %p557_p0 }
   0x8   :  { %565 = shalt.err (!%p562_p2)
}
   0x9   :  { %s566_s27 = scalar_lea.vmem %s20_s19, 2048  ;;  %p571_p4 = scmp.lt.s32.totalorder %s20_s19, %s20_s19 }
   0xa   :  { %p567_p3 = scmp.ne.s32.totalorder %s20_s19, %s566_s27  ;;  %p572_p5 = scmp.lt.s32.totalorder %s566_s27, %s566_s27 }
   0xc   :  { %p573_p6 = por %p572_p5, %p571_p4 }
   0xe   :  { %p574_p7 = pnand %p573_p6, %p567_p3 }
  0x10   :  { %577 = shalt.err (!%p574_p7)
}
  0x11   :  { %s629_s28 = smov 128   ;;  %s630_s29 = smov 8  }
  0x12   :  { %25 = dma.hbm_to_vmem [thread:$0]  %s719_s0, 2048, %s20_s19, [#allocation4], %s629_s28, %s629_s28, %s630_s29  }
  0x13   :  { %s631_s7 = smov [#allocation6]   ;;  %s578_s11 = scalar_lea.hbm %s720_s1, 2048 }
  0x14   :  { %s31_s8 = sshll.u32 %s631_s7, 4  ;;  %p579_p8 = scmp.ne.s32.totalorder %s720_s1, %s578_s11  ;;  %s32_s8 = int_to_ptr.vmem [resolvable:$true] %s31_s8 }
  0x15   :  { %p582_p9 = scmp.lt.u32.totalorder %s578_s11, %s720_s1 }
  0x17   :  { %p584_p10 = pnand %p582_p9, %p579_p8 }
  0x19   :  { %587 = shalt.err (!%p584_p10)
}
  0x1a   :  { %s588_s16 = scalar_lea.vmem %s32_s8, 2048  ;;  %p593_p12 = scmp.lt.s32.totalorder %s32_s8, %s32_s8 }
  0x1b   :  { %p589_p11 = scmp.ne.s32.totalorder %s32_s8, %s588_s16  ;;  %p594_p13 = scmp.lt.s32.totalorder %s588_s16, %s588_s16 }
  0x1d   :  { %p595_p0 = por %p594_p13, %p593_p12 }
  0x1f   :  { %p596_p1 = pnand %p595_p0, %p589_p11 }
  0x21   :  { %599 = shalt.err (!%p596_p1)
}
  0x22   :  { %37 = dma.hbm_to_vmem [thread:$0]  %s720_s1, 2048, %s32_s8, [#allocation7], %s629_s28, %s629_s28, %s630_s29  }
  0x23   :  { %622 = dma.done.wait [#allocation4], 2048  }
  0x24   :  { %623 = vsyncadd [#allocation4], 4294965248 }
  0x25   :  { %624 = dma.done.wait [#allocation7], 2048  }
  0x26   :  { %625 = vsyncadd [#allocation7], 4294965248  ;;  %v66_v0 = vld [vmem:[#allocation6] sm:$0xff]  ;;  %v67_v1 = vld [vmem:[#allocation6 + $0x8] sm:$0xff]  ;;  %v632_v40 = vmov 0.0|0.0   ;;  %vm633_vm0 = vmmov 0  }
  0x27   :  { %v68_v2 = vld [vmem:[#allocation6 + $0x10] sm:$0xff]  ;;  %v488_v3 = vpack.c.bf16 %v67_v1, %v66_v0  ;;  %v69_v4 = vld [vmem:[#allocation6 + $0x18] sm:$0xff]  ;;  %v70_v6 = vld [vmem:[#allocation6 + $0x20] sm:$0xff]  ;;  %520 = vmatprep.subr.bf16.mxu1 %v632_v40  ;;  %v634_v41 = vmov 0.0   ;;  %s635_s22 = smov [#allocation8]  }
  0x28   :  { %v492_v5 = vpack.c.bf16 %v69_v4, %v68_v2  ;;  %v71_v7 = vld [vmem:[#allocation6 + $0x28] sm:$0xff]  ;;  %v50_v9 = vld [vmem:[#allocation3] sm:$0xff]  ;;  %v72_v10 = vld [vmem:[#allocation6 + $0x30] sm:$0xff]  ;;  %485 = vmatprep.mubr.msk.f32.mxu1 %vm633_vm0, %v634_v41  ;;  %s336_s23 = sshll.u32 %s635_s22, 4  ;;  %s337_s23 = int_to_ptr.vmem [resolvable:$true] %s336_s23 }
  0x29   :  { %489 = vmatprep.subr.bf16.mxu0 %v488_v3  ;;  %v496_v8 = vpack.c.bf16 %v71_v7, %v70_v6  ;;  %v73_v11 = vld [vmem:[#allocation6 + $0x38] sm:$0xff]  ;;  %429 = vmatprep.mubr.f32.mxu0 %v50_v9  ;;  %v74_v13 = vld [vmem:[#allocation6 + $0x40] sm:$0xff]  ;;  %v75_v14 = vld [vmem:[#allocation6 + $0x48] sm:$0xff]  ;;  %s600_s24 = scalar_lea.vmem %s337_s23, 16  ;;  %p605_p3 = scmp.lt.s32.totalorder %s337_s23, %s337_s23 }
  0x2a   :  { %491 = vmatpush3.bf16.msra.mxu0 %v488_v3  ;;  %v500_v12 = vpack.c.bf16 %v73_v11, %v72_v10  ;;  %v504_v15 = vpack.c.bf16 %v75_v14, %v74_v13  ;;  %v76_v16 = vld [vmem:[#allocation6 + $0x50] sm:$0xff]  ;;  %v77_v17 = vld [vmem:[#allocation6 + $0x58] sm:$0xff]  ;;  %v78_v19 = vld [vmem:[#allocation6 + $0x60] sm:$0xff]  ;;  %p601_p2 = scmp.ne.s32.totalorder %s337_s23, %s600_s24 }
  0x2b   :  { %493 = vmatprep.subr.bf16.mxu0 %v492_v5  ;;  %v508_v18 = vpack.c.bf16 %v77_v17, %v76_v16  ;;  %v79_v20 = vld [vmem:[#allocation6 + $0x68] sm:$0xff]  ;;  %v80_v22 = vld [vmem:[#allocation6 + $0x70] sm:$0xff]  ;;  %v81_v23 = vld [vmem:[#allocation6 + $0x78] sm:$0xff] }
  0x2c   :  { %v512_v21 = vpack.c.bf16 %v79_v20, %v78_v19  ;;  %v516_v24 = vpack.c.bf16 %v81_v23, %v80_v22  ;;  %v51_v25 = vld [vmem:[#allocation3 + $0x8] sm:$0xff]  ;;  %v52_v26 = vld [vmem:[#allocation3 + $0x10] sm:$0xff]  ;;  %v53_v27 = vld [vmem:[#allocation3 + $0x18] sm:$0xff] }
  0x2d   :  { %v54_v28 = vld [vmem:[#allocation3 + $0x20] sm:$0xff]  ;;  %v55_v29 = vld [vmem:[#allocation3 + $0x28] sm:$0xff]  ;;  %v56_v30 = vld [vmem:[#allocation3 + $0x30] sm:$0xff] }
  0x2e   :  { %495 = vmatpush3.bf16.msra.mxu0 %v492_v5  ;;  %v57_v31 = vld [vmem:[#allocation3 + $0x38] sm:$0xff]  ;;  %v58_v32 = vld [vmem:[#allocation3 + $0x40] sm:$0xff]  ;;  %v59_v33 = vld [vmem:[#allocation3 + $0x48] sm:$0xff] }
  0x2f   :  { %497 = vmatprep.subr.bf16.mxu0 %v496_v8  ;;  %v60_v34 = vld [vmem:[#allocation3 + $0x50] sm:$0xff]  ;;  %v61_v35 = vld [vmem:[#allocation3 + $0x58] sm:$0xff]  ;;  %v62_v36 = vld [vmem:[#allocation3 + $0x60] sm:$0xff] }
  0x30   :  { %v63_v37 = vld [vmem:[#allocation3 + $0x68] sm:$0xff]  ;;  %v64_v38 = vld [vmem:[#allocation3 + $0x70] sm:$0xff]  ;;  %v65_v39 = vld [vmem:[#allocation3 + $0x78] sm:$0xff] }
  0x31   :  { %v346_v42 = vld [vmem:[%s721_s2] ss:$0 sm:$0xff] }
  0x32   :  { %499 = vmatpush3.bf16.msra.mxu0 %v496_v8 }
  0x33   :  { %501 = vmatprep.subr.bf16.mxu0 %v500_v12 }
  0x36   :  { %503 = vmatpush3.bf16.msra.mxu0 %v500_v12 }
  0x37   :  { %505 = vmatprep.subr.bf16.mxu0 %v504_v15 }
  0x3a   :  { %507 = vmatpush3.bf16.msra.mxu0 %v504_v15 }
  0x3b   :  { %509 = vmatprep.subr.bf16.mxu0 %v508_v18 }
  0x3e   :  { %511 = vmatpush3.bf16.msra.mxu0 %v508_v18 }
  0x3f   :  { %513 = vmatprep.subr.bf16.mxu0 %v512_v21 }
  0x42   :  { %515 = vmatpush3.bf16.msra.mxu0 %v512_v21 }
  0x43   :  { %517 = vmatprep.subr.bf16.mxu0 %v516_v24 }
  0x46   :  { %519 = vmatpush3.bf16.msra.mxu0 %v516_v24 }
  0x49   :  { %430 = vmatmul.mubr.f32.vlgmr.msra.gmra.mrb[0].mxu0 %v51_v25 }
  0x4a   :  { %432 = vmatprep.mubr.f32.mxu0 %v52_v26 }
  0x4d   :  { %433 = vmatmul.mubr.f32.gmra.mrb[2].mxu0 %v53_v27 }
  0x4e   :  { %435 = vmatprep.mubr.f32.mxu0 %v54_v28 }
  0x51   :  { %436 = vmatmul.mubr.f32.gmra.mrb[4].mxu0 %v55_v29 }
  0x52   :  { %438 = vmatprep.mubr.f32.mxu0 %v56_v30 }
  0x55   :  { %439 = vmatmul.mubr.f32.gmra.mrb[6].mxu0 %v57_v31 }
  0x56   :  { %441 = vmatprep.mubr.f32.mxu0 %v58_v32 }
  0x59   :  { %442 = vmatmul.mubr.f32.gmra.mrb[8].mxu0 %v59_v33 }
  0x5a   :  { %444 = vmatprep.mubr.f32.mxu0 %v60_v34 }
  0x5d   :  { %445 = vmatmul.mubr.f32.gmra.mrb[10].mxu0 %v61_v35  ;;  %v250_v35 = vld [vmem:[%s722_s3] sm:$0x1]  ;;  %s604_s3 = scalar_lea.vmem %s337_s23, 32 }
  0x5e   :  { %447 = vmatprep.mubr.f32.mxu0 %v62_v36  ;;  %v252_v36 = vstv %s723_s4  ;;  %p606_p4 = scmp.lt.s32.totalorder %s604_s3, %s600_s24 }
  0x60   :  { %p607_p5 = por %p606_p4, %p605_p3 }
  0x61   :  { %448 = vmatmul.mubr.f32.gmra.mrb[12].mxu0 %v63_v37 }
  0x62   :  { %450 = vmatprep.mubr.f32.mxu0 %v64_v38  ;;  %p608_p6 = pnand %p607_p5, %p601_p2 }
  0x65   :  { %451 = vmatmul.mubr.f32.gmra.mrb[14].mxu0 %v65_v39 }
 0x11c   :  { %v431_v43 = vpop.f32.mrb[0].mxu0 }
 0x11d   :  { %v161_v44 = vadd.f32 %v431_v43, %v346_v42  ;;  %v155_v45 = vpop.f32.mrb[1].mxu0 }
 0x11e   :  { %v156_v46 = vadd.f32 %v346_v42, %v155_v45 }
 0x11f   :  { %v235_v47 = vmax.f32 %v161_v44, 0.0 }
 0x120   :  { %v234_v48 = vmax.f32 %v156_v46, 0.0  ;;  %v434_v49 = vpop.f32.mrb[2].mxu0 }
 0x121   :  { %v171_v50 = vadd.f32 %v434_v49, %v346_v42  ;;  %v165_v51 = vpop.f32.mrb[3].mxu0 }
 0x122   :  { %v166_v52 = vadd.f32 %v346_v42, %v165_v51  ;;  %v521_v53 = vpack.c.bf16 %v235_v47, %v234_v48 }
 0x123   :  { %v237_v54 = vmax.f32 %v171_v50, 0.0 }
 0x124   :  { %v236_v55 = vmax.f32 %v166_v52, 0.0  ;;  %522 = vmatpush3.bf16.xpose.msra.mxu1 %v521_v53  ;;  %v437_v56 = vpop.f32.mrb[4].mxu0 }
 0x125   :  { %v181_v57 = vadd.f32 %v437_v56, %v346_v42  ;;  %523 = vmatprep.subr.bf16.mxu1 %v632_v40  ;;  %v175_v58 = vpop.f32.mrb[5].mxu0 }
 0x126   :  { %v524_v59 = vpack.c.bf16 %v237_v54, %v236_v55  ;;  %v176_v60 = vadd.f32 %v346_v42, %v175_v58 }
 0x127   :  { %v239_v61 = vmax.f32 %v181_v57, 0.0 }
 0x128   :  { %v238_v62 = vmax.f32 %v176_v60, 0.0  ;;  %v440_v63 = vpop.f32.mrb[6].mxu0 }
 0x129   :  { %v191_v0 = vadd.f32 %v440_v63, %v346_v42  ;;  %v185_v1 = vpop.f32.mrb[7].mxu0 }
 0x12a   :  { %v527_v2 = vpack.c.bf16 %v239_v61, %v238_v62  ;;  %v186_v3 = vadd.f32 %v346_v42, %v185_v1 }
 0x12b   :  { %v241_v4 = vmax.f32 %v191_v0, 0.0 }
 0x12c   :  { %525 = vmatpush3.bf16.xpose.msra.mxu1 %v524_v59  ;;  %v240_v5 = vmax.f32 %v186_v3, 0.0  ;;  %v443_v6 = vpop.f32.mrb[8].mxu0 }
 0x12d   :  { %526 = vmatprep.subr.bf16.mxu1 %v632_v40  ;;  %v201_v7 = vadd.f32 %v443_v6, %v346_v42  ;;  %v195_v8 = vpop.f32.mrb[9].mxu0 }
 0x12e   :  { %v530_v9 = vpack.c.bf16 %v241_v4, %v240_v5  ;;  %v196_v10 = vadd.f32 %v346_v42, %v195_v8 }
 0x12f   :  { %v243_v11 = vmax.f32 %v201_v7, 0.0 }
 0x130   :  { %v242_v12 = vmax.f32 %v196_v10, 0.0  ;;  %v446_v13 = vpop.f32.mrb[10].mxu0 }
 0x131   :  { %v211_v14 = vadd.f32 %v446_v13, %v346_v42  ;;  %v205_v15 = vpop.f32.mrb[11].mxu0 }
 0x132   :  { %v533_v16 = vpack.c.bf16 %v243_v11, %v242_v12  ;;  %v206_v17 = vadd.f32 %v346_v42, %v205_v15 }
 0x133   :  { %v245_v18 = vmax.f32 %v211_v14, 0.0 }
 0x134   :  { %528 = vmatpush3.bf16.xpose.msra.mxu1 %v527_v2  ;;  %v244_v19 = vmax.f32 %v206_v17, 0.0  ;;  %v449_v20 = vpop.f32.mrb[12].mxu0 }
 0x135   :  { %529 = vmatprep.subr.bf16.mxu1 %v632_v40  ;;  %v221_v21 = vadd.f32 %v449_v20, %v346_v42  ;;  %v215_v22 = vpop.f32.mrb[13].mxu0 }
 0x136   :  { %v536_v23 = vpack.c.bf16 %v245_v18, %v244_v19  ;;  %v216_v24 = vadd.f32 %v346_v42, %v215_v22 }
 0x137   :  { %v247_v25 = vmax.f32 %v221_v21, 0.0 }
 0x138   :  { %v246_v26 = vmax.f32 %v216_v24, 0.0  ;;  %v452_v27 = vpop.f32.mrb[14].mxu0 }
 0x139   :  { %v231_v28 = vadd.f32 %v452_v27, %v346_v42  ;;  %v225_v29 = vpop.f32.mrb[15].mxu0 }
 0x13a   :  { %v539_v30 = vpack.c.bf16 %v247_v25, %v246_v26  ;;  %v226_v31 = vadd.f32 %v346_v42, %v225_v29 }
 0x13b   :  { %v249_v32 = vmax.f32 %v231_v28, 0.0 }
 0x13c   :  { %531 = vmatpush3.bf16.xpose.msra.mxu1 %v530_v9  ;;  %v248_v33 = vmax.f32 %v226_v31, 0.0 }
 0x13d   :  { %532 = vmatprep.subr.bf16.mxu1 %v632_v40 }
 0x13e   :  { %v542_v34 = vpack.c.bf16 %v249_v32, %v248_v33 }
 0x144   :  { %534 = vmatpush3.bf16.xpose.msra.mxu1 %v533_v16 }
 0x145   :  { %535 = vmatprep.subr.bf16.mxu1 %v632_v40 }
 0x14c   :  { %537 = vmatpush3.bf16.xpose.msra.mxu1 %v536_v23 }
 0x14d   :  { %538 = vmatprep.subr.bf16.mxu1 %v632_v40 }
 0x154   :  { %540 = vmatpush3.bf16.xpose.msra.mxu1 %v539_v30 }
 0x155   :  { %541 = vmatprep.subr.bf16.mxu1 %v632_v40 }
 0x15c   :  { %543 = vmatpush3.bf16.xpose.msra.mxu1 %v542_v34 }
 0x163   :  { %486 = vmatmul.mubr.f32.vlgmr.msra.gmra.mrb[0].mxu1 %v250_v35 }
 0x236   :  { %v319_v37 = vpop.f32.mrb[0].mxu1 }
 0x237   :  { %v320_v38 = vadd.f32 %v319_v37, %v252_v36  ;;  %v487_v39 = vpop.f32.mrb[1].mxu1 }
 0x239   :  { %v347_v41 = vmul.f32 -1.442695, %v320_v38 }
 0x23b   :  { %552 = vpow2.f32 %v347_v41 }
 0x245   :  { %v553_v42 = vpop.eup %552 }
 0x246   :  { %v326_v43 = vadd.f32 1.0, %v553_v42 }
 0x248   :  { %554 = vrcp.f32 %v326_v43 }
 0x252   :  { %v555_v40 = vpop.eup %554 }
 0x253   :  { %329 = vst [vmem:[#allocation8] sm:$0x1] %v555_v40 }
 0x254   :  { %611 = shalt.err (!%p608_p6)
}
 0x255   :  { %s612_s26 = scalar_lea.hbm %s724_s5, 16 }
 0x256   :  { %p613_p7 = scmp.ne.s32.totalorder %s724_s5, %s612_s26  ;;  %p616_p8 = scmp.lt.u32.totalorder %s612_s26, %s724_s5 }
 0x258   :  { %p618_p9 = pnand %p616_p8, %p613_p7 }
 0x25a   :  { %621 = shalt.err (!%p618_p9)
}
 0x25b   :  { %339 = dma.vmem_to_hbm [thread:$0]  %s337_s23, 16, %s724_s5, [#allocation5]  }
 0x25c   :  { %626 = dma.done.wait [#allocation5], 16  }
 0x25d   :  { %627 = vsyncadd [#allocation5], 4294967280 }
 0x25e   :  { %343 = vsyncpa [#allocation4], 1 }
 0x25f   :  { %344 = vsyncpa [#allocation7], 1 }
 0x260   :  { %345 = vsyncpa [#allocation5], 1 }

</bundles_post_ra>
